<compile_context>
chip_gen: v5e
topology: v5e:2x2
jax: 0.10.0
libtpu: 0.0.40
codegen_flags: <defaults>
</compile_context>

<pallas_src>
import functools

import jax
import jax.numpy as jnp
from jax.experimental import pallas as pl
from jax.experimental.pallas import tpu as pltpu


def _decoder_kernel(h0_ref, c0_ref, wbig_ref, bbig_ref, wd_ref, bd_ref,
                    out_ref, *, hidden, n_features, seq_len):
    """Whole seq_len recurrence for one batch tile.

    h0_ref, c0_ref : (Bt, H)          initial hidden / cell states
    wbig_ref       : (H, Wpad)        fused [W_comb | Wd^T | zero-pad], gate
                                      columns permuted to (i, f, o, g)
    bbig_ref       : (1, Wpad)        fused [b_comb | bd | zero-pad], f32
    wd_ref         : (H, F)           readout weight (transposed)
    bd_ref         : (1, F)           readout bias, f32
    out_ref        : (Bt, seq_len*F)  lane-dense output slab
    """
    H = hidden
    F = n_features
    G = 4 * H                              # gate block width

    h = h0_ref[...].astype(jnp.float32)
    c = c0_ref[...].astype(jnp.float32)
    w_big = wbig_ref[...]
    b_big = bbig_ref[...]                  # f32
    wd = wd_ref[...]
    bd = bd_ref[...]                       # f32
    cdtype = w_big.dtype                   # MXU operand dtype (f32 or bf16)

    outs = []
    # Static unroll: seq_len is small here.
    # TODO(synk): for long sequences switch to lax.fori_loop(..., unroll=4)
    # writing into a VMEM scratch instead of fully unrolling.
    for t in range(seq_len):
        # One fused matmul per step: columns [0, 4H) are gates_{t+1} computed
        # from h_t, columns [4H, 4H+F) are x_t = dense(h_t) (previous step's
        # readout; for t == 0 it is the unused initial x).
        z = (jnp.dot(h.astype(cdtype), w_big,
                     preferred_element_type=jnp.float32) + b_big)
        if t > 0:
            outs.append(z[:, G:G + F])     # output index t-1
        gates = z[:, :G]
        # Gate order after wrapper permutation: (i, f, o, g).
        # sigmoid(x) == 0.5 * tanh(0.5 * x) + 0.5  (exact identity).
        sig = 0.5 * jnp.tanh(0.5 * gates[:, :3 * H]) + 0.5
        g_g = jnp.tanh(gates[:, 3 * H:4 * H])
        i_g = sig[:, 0 * H:1 * H]
        f_g = sig[:, 1 * H:2 * H]
        o_g = sig[:, 2 * H:3 * H]
        c = f_g * c + i_g * g_g
        h = o_g * jnp.tanh(c)

    # Final readout x_{seq_len} = dense(h_{seq_len}).
    x_last = (jnp.dot(h.astype(cdtype), wd,
                      preferred_element_type=jnp.float32) + bd)
    outs.append(x_last)

    # Single lane-dense store of the full (Bt, seq_len * F) slab.
    out_ref[...] = jnp.concatenate(outs, axis=1).astype(out_ref.dtype)


def recurrent_decoder_lstm(h0, c0, params, seq_len, *,
                           weight_dtype=jnp.float32, batch_block=256):
    """Wrapper: weight fusion + gate permutation + pallas_call.

    h0, c0 : (B, H) squeezed initial hidden / cell states.
    params : PyTorch-convention shapes:
        w_ih (4H, F), w_hh (4H, H), b_ih (4H,), b_hh (4H,),
        w_dense (F, H), b_dense (F,)
    weight_dtype : jnp.float32 or jnp.bfloat16 (bf16 recommended on v6e/v7x).
    Returns (B, seq_len, F) float32.
    """
    B, H = h0.shape
    F = params["w_dense"].shape[0]
    G = 4 * H
    hp = jax.lax.Precision.HIGHEST   # keep host-side fusion at f32 accuracy

    wih_t = jnp.transpose(params["w_ih"]).astype(jnp.float32)        # (F, 4H)
    whh_t = jnp.transpose(params["w_hh"]).astype(jnp.float32)        # (H, 4H)
    b = (params["b_ih"] + params["b_hh"]).reshape(1, G).astype(jnp.float32)
    wd_t = jnp.transpose(params["w_dense"]).astype(jnp.float32)      # (H, F)
    bd = params["b_dense"].reshape(1, F).astype(jnp.float32)         # (1, F)

    # Algebraic fusion of the per-step input projection into the recurrence:
    #   gates_{t+1} = h_t @ (wd_t @ wih_t + whh_t) + (bd @ wih_t + b)
    w_comb = jnp.dot(wd_t, wih_t, precision=hp) + whh_t              # (H, 4H)
    b_comb = jnp.dot(bd, wih_t, precision=hp) + b                    # (1, 4H)

    # Permute gate columns (i, f, g, o) -> (i, f, o, g): one sigmoid slab and
    # one tanh slab inside the kernel.
    perm = jnp.concatenate([jnp.arange(0, 2 * H),
                            jnp.arange(3 * H, 4 * H),
                            jnp.arange(2 * H, 3 * H)])
    w_comb = w_comb[:, perm]
    b_comb = b_comb[:, perm]

    # Fuse the readout into the same per-step matmul and pad lanes to a
    # multiple of 128 so the matmul result is vreg-aligned.
    w_big = jnp.concatenate([w_comb, wd_t], axis=1)                  # (H, 4H+F)
    b_big = jnp.concatenate([b_comb, bd], axis=1)                    # (1, 4H+F)
    wpad = ((G + F + 127) // 128) * 128
    lane_pad = wpad - (G + F)
    if lane_pad:
        w_big = jnp.pad(w_big, ((0, 0), (0, lane_pad)))
        b_big = jnp.pad(b_big, ((0, 0), (0, lane_pad)))

    w_big = w_big.astype(weight_dtype)          # biases stay f32
    wd_k = wd_t.astype(weight_dtype)

    # Batch tiling: single block for small B; parallel grid (megacore / v7x
    # dual-TC) for large B.  Block shapes obey the (8,128)-or-full-dim rule.
    bb = B if B <= batch_block else batch_block
    grid = (pl.cdiv(B, bb),)

    kernel = functools.partial(_decoder_kernel,
                               hidden=H, n_features=F, seq_len=seq_len)
    out = pl.pallas_call(
        kernel,
        out_shape=jax.ShapeDtypeStruct((B, seq_len * F), jnp.float32),
        grid=grid,
        in_specs=[
            pl.BlockSpec((bb, H), lambda i: (i, 0)),      # h0
            pl.BlockSpec((bb, H), lambda i: (i, 0)),      # c0
            pl.BlockSpec((H, wpad), lambda i: (0, 0)),    # fused weights
            pl.BlockSpec((1, wpad), lambda i: (0, 0)),    # fused bias
            pl.BlockSpec((H, F), lambda i: (0, 0)),       # readout weight
            pl.BlockSpec((1, F), lambda i: (0, 0)),       # readout bias
        ],
        out_specs=pl.BlockSpec((bb, seq_len * F), lambda i: (i, 0)),
        compiler_params=pltpu.CompilerParams(
            dimension_semantics=("parallel",)),
    )(h0.astype(jnp.float32), c0.astype(jnp.float32),
      w_big, b_big, wd_k, bd)

    return out.reshape(B, seq_len, F)


def _reference(h0, c0, params, seq_len):
    """Pure-JAX transcription of the PyTorch forward (f32, PyTorch gate order)."""
    h = h0.astype(jnp.float32)
    c = c0.astype(jnp.float32)
    wih = params["w_ih"].astype(jnp.float32)
    whh = params["w_hh"].astype(jnp.float32)
    b = (params["b_ih"] + params["b_hh"]).astype(jnp.float32)
    wd = params["w_dense"].astype(jnp.float32)
    bd = params["b_dense"].astype(jnp.float32)
    hp = jax.lax.Precision.HIGHEST
    H = h.shape[1]
    x = jnp.dot(h, wd.T, precision=hp) + bd
    outs = []
    for _ in range(seq_len):
        gates = (jnp.dot(x, wih.T, precision=hp)
                 + jnp.dot(h, whh.T, precision=hp) + b)
        i_g = jax.nn.sigmoid(gates[:, 0 * H:1 * H])
        f_g = jax.nn.sigmoid(gates[:, 1 * H:2 * H])
        g_g = jnp.tanh(gates[:, 2 * H:3 * H])
        o_g = jax.nn.sigmoid(gates[:, 3 * H:4 * H])
        c = f_g * c + i_g * g_g
        h = o_g * jnp.tanh(c)
        x = jnp.dot(h, wd.T, precision=hp) + bd
        outs.append(x)
    return jnp.concatenate(outs, axis=1).reshape(-1, seq_len, x.shape[1])


if __name__ == "__main__":
    B = 2            # batch
    LATENT = 32      # latent_dim (hidden size H)
    N_FEATURES = 4   # n_features (F)
    SEQ_LEN = 8

    key = jax.random.PRNGKey(0)
    k = iter(jax.random.split(key, 10))

    scale = 1.0 / jnp.sqrt(LATENT)
    params = {
        "w_ih": jax.random.uniform(next(k), (4 * LATENT, N_FEATURES),
                                   minval=-scale, maxval=scale),
        "w_hh": jax.random.uniform(next(k), (4 * LATENT, LATENT),
                                   minval=-scale, maxval=scale),
        "b_ih": jax.random.uniform(next(k), (4 * LATENT,),
                                   minval=-scale, maxval=scale),
        "b_hh": jax.random.uniform(next(k), (4 * LATENT,),
                                   minval=-scale, maxval=scale),
        "w_dense": jax.random.uniform(next(k), (N_FEATURES, LATENT),
                                      minval=-scale, maxval=scale),
        "b_dense": jax.random.uniform(next(k), (N_FEATURES,),
                                      minval=-scale, maxval=scale),
    }

    h0 = jax.random.normal(next(k), (B, LATENT), dtype=jnp.float32)
    c0 = jax.random.normal(next(k), (B, LATENT), dtype=jnp.float32)

    ref = _reference(h0, c0, params, SEQ_LEN)

    # f32-weight path: tight check against the f32 reference.
    out = recurrent_decoder_lstm(h0, c0, params, SEQ_LEN,
                                 weight_dtype=jnp.float32)
    out = jax.block_until_ready(out)
    assert out.shape == (B, SEQ_LEN, N_FEATURES), out.shape
    assert jnp.allclose(out, ref, atol=1e-4, rtol=1e-4), \
        float(jnp.max(jnp.abs(out - ref)))

    # bf16-weight path (v6e/v7x MXU-friendly): loose check, bf16 rounding of
    # the fused weights perturbs the recurrence at the ~1e-2 level.
    out_bf16 = recurrent_decoder_lstm(h0, c0, params, SEQ_LEN,
                                      weight_dtype=jnp.bfloat16)
    out_bf16 = jax.block_until_ready(out_bf16)
    assert out_bf16.shape == (B, SEQ_LEN, N_FEATURES), out_bf16.shape
    assert float(jnp.max(jnp.abs(out_bf16 - ref))) < 0.15

    print("KERNEL_OK")
</pallas_src>

<mosaic_0001>
module attributes {stable_mosaic.version = 11 : i64} {
  func.func @_decoder_kernel(%arg0: i32, %arg1: memref<2x32xf32, #tpu.memory_space<vmem>>, %arg2: memref<2x32xf32, #tpu.memory_space<vmem>>, %arg3: memref<32x256xf32, #tpu.memory_space<vmem>>, %arg4: memref<1x256xf32, #tpu.memory_space<vmem>>, %arg5: memref<32x4xf32, #tpu.memory_space<vmem>>, %arg6: memref<1x4xf32, #tpu.memory_space<vmem>>, %arg7: memref<2x32xf32, #tpu.memory_space<vmem>>) attributes {dimension_semantics = [#tpu.dimension_semantics<parallel>], iteration_bounds = array<i64: 1>, scalar_prefetch = 0 : i64, scratch_operands = 0 : i64, tpu.core_type = #tpu.core_type<tc>, window_params = [{transform_indices = @transform_0, window_bounds = array<i64: 2, 32>}, {transform_indices = @transform_1, window_bounds = array<i64: 2, 32>}, {pipeline_mode = #tpu.pipeline_mode<synchronous>, transform_indices = @transform_2, window_bounds = array<i64: 32, 256>}, {pipeline_mode = #tpu.pipeline_mode<synchronous>, transform_indices = @transform_3, window_bounds = array<i64: 1, 256>}, {pipeline_mode = #tpu.pipeline_mode<synchronous>, transform_indices = @transform_4, window_bounds = array<i64: 32, 4>}, {pipeline_mode = #tpu.pipeline_mode<synchronous>, transform_indices = @transform_5, window_bounds = array<i64: 1, 4>}, {transform_indices = @transform_6, window_bounds = array<i64: 2, 32>}]} {
    %c0 = arith.constant 0 : index
    %c0_0 = arith.constant 0 : index
    %0 = vector.load %arg1[%c0, %c0_0] : memref<2x32xf32, #tpu.memory_space<vmem>>, vector<2x32xf32>
    %c0_1 = arith.constant 0 : index
    %c0_2 = arith.constant 0 : index
    %1 = vector.load %arg2[%c0_1, %c0_2] : memref<2x32xf32, #tpu.memory_space<vmem>>, vector<2x32xf32>
    %c0_3 = arith.constant 0 : index
    %c0_4 = arith.constant 0 : index
    %2 = vector.load %arg3[%c0_3, %c0_4] : memref<32x256xf32, #tpu.memory_space<vmem>>, vector<32x256xf32>
    %c0_5 = arith.constant 0 : index
    %c0_6 = arith.constant 0 : index
    %3 = vector.load %arg4[%c0_5, %c0_6] : memref<1x256xf32, #tpu.memory_space<vmem>>, vector<1x256xf32>
    %c0_7 = arith.constant 0 : index
    %c0_8 = arith.constant 0 : index
    %4 = vector.load %arg5[%c0_7, %c0_8] : memref<32x4xf32, #tpu.memory_space<vmem>>, vector<32x4xf32>
    %c0_9 = arith.constant 0 : index
    %c0_10 = arith.constant 0 : index
    %5 = vector.load %arg6[%c0_9, %c0_10] : memref<1x4xf32, #tpu.memory_space<vmem>>, vector<1x4xf32>
    %cst = arith.constant dense<0.000000e+00> : vector<2x256xf32>
    %6 = tpu.matmul %0, %2, %cst {dimension_numbers = #tpu.dot_dimension_numbers<[1], [0], [0], [1], [0, 0, 1, 1], [], []>} : vector<2x32xf32>, vector<32x256xf32>, vector<2x256xf32> -> vector<2x256xf32>
    %7 = vector.broadcast %3 : vector<1x256xf32> to vector<2x256xf32>
    %8 = arith.addf %6, %7 : vector<2x256xf32>
    %9 = vector.extract_strided_slice %8 {offsets = [0, 0], sizes = [2, 128], strides = [1, 1]} : vector<2x256xf32> to vector<2x128xf32>
    %10 = vector.extract_strided_slice %9 {offsets = [0, 0], sizes = [2, 96], strides = [1, 1]} : vector<2x128xf32> to vector<2x96xf32>
    %cst_11 = arith.constant 5.000000e-01 : f32
    %11 = vector.broadcast %cst_11 : f32 to vector<2x96xf32>
    %12 = arith.mulf %11, %10 : vector<2x96xf32>
    %13 = math.tanh %12 : vector<2x96xf32>
    %cst_12 = arith.constant 5.000000e-01 : f32
    %14 = vector.broadcast %cst_12 : f32 to vector<2x96xf32>
    %15 = arith.mulf %14, %13 : vector<2x96xf32>
    %cst_13 = arith.constant 5.000000e-01 : f32
    %16 = vector.broadcast %cst_13 : f32 to vector<2x96xf32>
    %17 = arith.addf %15, %16 : vector<2x96xf32>
    %18 = vector.extract_strided_slice %9 {offsets = [0, 96], sizes = [2, 32], strides = [1, 1]} : vector<2x128xf32> to vector<2x32xf32>
    %19 = math.tanh %18 : vector<2x32xf32>
    %20 = vector.extract_strided_slice %17 {offsets = [0, 0], sizes = [2, 32], strides = [1, 1]} : vector<2x96xf32> to vector<2x32xf32>
    %21 = vector.extract_strided_slice %17 {offsets = [0, 32], sizes = [2, 32], strides = [1, 1]} : vector<2x96xf32> to vector<2x32xf32>
    %22 = vector.extract_strided_slice %17 {offsets = [0, 64], sizes = [2, 32], strides = [1, 1]} : vector<2x96xf32> to vector<2x32xf32>
    %23 = arith.mulf %21, %1 : vector<2x32xf32>
    %24 = arith.mulf %20, %19 : vector<2x32xf32>
    %25 = arith.addf %23, %24 : vector<2x32xf32>
    %26 = math.tanh %25 : vector<2x32xf32>
    %27 = arith.mulf %22, %26 : vector<2x32xf32>
    %cst_14 = arith.constant dense<0.000000e+00> : vector<2x256xf32>
    %28 = tpu.matmul %27, %2, %cst_14 {dimension_numbers = #tpu.dot_dimension_numbers<[1], [0], [0], [1], [0, 0, 1, 1], [], []>} : vector<2x32xf32>, vector<32x256xf32>, vector<2x256xf32> -> vector<2x256xf32>
    %29 = vector.broadcast %3 : vector<1x256xf32> to vector<2x256xf32>
    %30 = arith.addf %28, %29 : vector<2x256xf32>
    %31 = vector.extract_strided_slice %30 {offsets = [0, 128], sizes = [2, 4], strides = [1, 1]} : vector<2x256xf32> to vector<2x4xf32>
    %32 = vector.extract_strided_slice %30 {offsets = [0, 0], sizes = [2, 128], strides = [1, 1]} : vector<2x256xf32> to vector<2x128xf32>
    %33 = vector.extract_strided_slice %32 {offsets = [0, 0], sizes = [2, 96], strides = [1, 1]} : vector<2x128xf32> to vector<2x96xf32>
    %cst_15 = arith.constant 5.000000e-01 : f32
    %34 = vector.broadcast %cst_15 : f32 to vector<2x96xf32>
    %35 = arith.mulf %34, %33 : vector<2x96xf32>
    %36 = math.tanh %35 : vector<2x96xf32>
    %cst_16 = arith.constant 5.000000e-01 : f32
    %37 = vector.broadcast %cst_16 : f32 to vector<2x96xf32>
    %38 = arith.mulf %37, %36 : vector<2x96xf32>
    %cst_17 = arith.constant 5.000000e-01 : f32
    %39 = vector.broadcast %cst_17 : f32 to vector<2x96xf32>
    %40 = arith.addf %38, %39 : vector<2x96xf32>
    %41 = vector.extract_strided_slice %32 {offsets = [0, 96], sizes = [2, 32], strides = [1, 1]} : vector<2x128xf32> to vector<2x32xf32>
    %42 = math.tanh %41 : vector<2x32xf32>
    %43 = vector.extract_strided_slice %40 {offsets = [0, 0], sizes = [2, 32], strides = [1, 1]} : vector<2x96xf32> to vector<2x32xf32>
    %44 = vector.extract_strided_slice %40 {offsets = [0, 32], sizes = [2, 32], strides = [1, 1]} : vector<2x96xf32> to vector<2x32xf32>
    %45 = vector.extract_strided_slice %40 {offsets = [0, 64], sizes = [2, 32], strides = [1, 1]} : vector<2x96xf32> to vector<2x32xf32>
    %46 = arith.mulf %44, %25 : vector<2x32xf32>
    %47 = arith.mulf %43, %42 : vector<2x32xf32>
    %48 = arith.addf %46, %47 : vector<2x32xf32>
    %49 = math.tanh %48 : vector<2x32xf32>
    %50 = arith.mulf %45, %49 : vector<2x32xf32>
    %cst_18 = arith.constant dense<0.000000e+00> : vector<2x256xf32>
    %51 = tpu.matmul %50, %2, %cst_18 {dimension_numbers = #tpu.dot_dimension_numbers<[1], [0], [0], [1], [0, 0, 1, 1], [], []>} : vector<2x32xf32>, vector<32x256xf32>, vector<2x256xf32> -> vector<2x256xf32>
    %52 = vector.broadcast %3 : vector<1x256xf32> to vector<2x256xf32>
    %53 = arith.addf %51, %52 : vector<2x256xf32>
    %54 = vector.extract_strided_slice %53 {offsets = [0, 128], sizes = [2, 4], strides = [1, 1]} : vector<2x256xf32> to vector<2x4xf32>
    %55 = vector.extract_strided_slice %53 {offsets = [0, 0], sizes = [2, 128], strides = [1, 1]} : vector<2x256xf32> to vector<2x128xf32>
    %56 = vector.extract_strided_slice %55 {offsets = [0, 0], sizes = [2, 96], strides = [1, 1]} : vector<2x128xf32> to vector<2x96xf32>
    %cst_19 = arith.constant 5.000000e-01 : f32
    %57 = vector.broadcast %cst_19 : f32 to vector<2x96xf32>
    %58 = arith.mulf %57, %56 : vector<2x96xf32>
    %59 = math.tanh %58 : vector<2x96xf32>
    %cst_20 = arith.constant 5.000000e-01 : f32
    %60 = vector.broadcast %cst_20 : f32 to vector<2x96xf32>
    %61 = arith.mulf %60, %59 : vector<2x96xf32>
    %cst_21 = arith.constant 5.000000e-01 : f32
    %62 = vector.broadcast %cst_21 : f32 to vector<2x96xf32>
    %63 = arith.addf %61, %62 : vector<2x96xf32>
    %64 = vector.extract_strided_slice %55 {offsets = [0, 96], sizes = [2, 32], strides = [1, 1]} : vector<2x128xf32> to vector<2x32xf32>
    %65 = math.tanh %64 : vector<2x32xf32>
    %66 = vector.extract_strided_slice %63 {offsets = [0, 0], sizes = [2, 32], strides = [1, 1]} : vector<2x96xf32> to vector<2x32xf32>
    %67 = vector.extract_strided_slice %63 {offsets = [0, 32], sizes = [2, 32], strides = [1, 1]} : vector<2x96xf32> to vector<2x32xf32>
    %68 = vector.extract_strided_slice %63 {offsets = [0, 64], sizes = [2, 32], strides = [1, 1]} : vector<2x96xf32> to vector<2x32xf32>
    %69 = arith.mulf %67, %48 : vector<2x32xf32>
    %70 = arith.mulf %66, %65 : vector<2x32xf32>
    %71 = arith.addf %69, %70 : vector<2x32xf32>
    %72 = math.tanh %71 : vector<2x32xf32>
    %73 = arith.mulf %68, %72 : vector<2x32xf32>
    %cst_22 = arith.constant dense<0.000000e+00> : vector<2x256xf32>
    %74 = tpu.matmul %73, %2, %cst_22 {dimension_numbers = #tpu.dot_dimension_numbers<[1], [0], [0], [1], [0, 0, 1, 1], [], []>} : vector<2x32xf32>, vector<32x256xf32>, vector<2x256xf32> -> vector<2x256xf32>
    %75 = vector.broadcast %3 : vector<1x256xf32> to vector<2x256xf32>
    %76 = arith.addf %74, %75 : vector<2x256xf32>
    %77 = vector.extract_strided_slice %76 {offsets = [0, 128], sizes = [2, 4], strides = [1, 1]} : vector<2x256xf32> to vector<2x4xf32>
    %78 = vector.extract_strided_slice %76 {offsets = [0, 0], sizes = [2, 128], strides = [1, 1]} : vector<2x256xf32> to vector<2x128xf32>
    %79 = vector.extract_strided_slice %78 {offsets = [0, 0], sizes = [2, 96], strides = [1, 1]} : vector<2x128xf32> to vector<2x96xf32>
    %cst_23 = arith.constant 5.000000e-01 : f32
    %80 = vector.broadcast %cst_23 : f32 to vector<2x96xf32>
    %81 = arith.mulf %80, %79 : vector<2x96xf32>
    %82 = math.tanh %81 : vector<2x96xf32>
    %cst_24 = arith.constant 5.000000e-01 : f32
    %83 = vector.broadcast %cst_24 : f32 to vector<2x96xf32>
    %84 = arith.mulf %83, %82 : vector<2x96xf32>
    %cst_25 = arith.constant 5.000000e-01 : f32
    %85 = vector.broadcast %cst_25 : f32 to vector<2x96xf32>
    %86 = arith.addf %84, %85 : vector<2x96xf32>
    %87 = vector.extract_strided_slice %78 {offsets = [0, 96], sizes = [2, 32], strides = [1, 1]} : vector<2x128xf32> to vector<2x32xf32>
    %88 = math.tanh %87 : vector<2x32xf32>
    %89 = vector.extract_strided_slice %86 {offsets = [0, 0], sizes = [2, 32], strides = [1, 1]} : vector<2x96xf32> to vector<2x32xf32>
    %90 = vector.extract_strided_slice %86 {offsets = [0, 32], sizes = [2, 32], strides = [1, 1]} : vector<2x96xf32> to vector<2x32xf32>
    %91 = vector.extract_strided_slice %86 {offsets = [0, 64], sizes = [2, 32], strides = [1, 1]} : vector<2x96xf32> to vector<2x32xf32>
    %92 = arith.mulf %90, %71 : vector<2x32xf32>
    %93 = arith.mulf %89, %88 : vector<2x32xf32>
    %94 = arith.addf %92, %93 : vector<2x32xf32>
    %95 = math.tanh %94 : vector<2x32xf32>
    %96 = arith.mulf %91, %95 : vector<2x32xf32>
    %cst_26 = arith.constant dense<0.000000e+00> : vector<2x256xf32>
    %97 = tpu.matmul %96, %2, %cst_26 {dimension_numbers = #tpu.dot_dimension_numbers<[1], [0], [0], [1], [0, 0, 1, 1], [], []>} : vector<2x32xf32>, vector<32x256xf32>, vector<2x256xf32> -> vector<2x256xf32>
    %98 = vector.broadcast %3 : vector<1x256xf32> to vector<2x256xf32>
    %99 = arith.addf %97, %98 : vector<2x256xf32>
    %100 = vector.extract_strided_slice %99 {offsets = [0, 128], sizes = [2, 4], strides = [1, 1]} : vector<2x256xf32> to vector<2x4xf32>
    %101 = vector.extract_strided_slice %99 {offsets = [0, 0], sizes = [2, 128], strides = [1, 1]} : vector<2x256xf32> to vector<2x128xf32>
    %102 = vector.extract_strided_slice %101 {offsets = [0, 0], sizes = [2, 96], strides = [1, 1]} : vector<2x128xf32> to vector<2x96xf32>
    %cst_27 = arith.constant 5.000000e-01 : f32
    %103 = vector.broadcast %cst_27 : f32 to vector<2x96xf32>
    %104 = arith.mulf %103, %102 : vector<2x96xf32>
    %105 = math.tanh %104 : vector<2x96xf32>
    %cst_28 = arith.constant 5.000000e-01 : f32
    %106 = vector.broadcast %cst_28 : f32 to vector<2x96xf32>
    %107 = arith.mulf %106, %105 : vector<2x96xf32>
    %cst_29 = arith.constant 5.000000e-01 : f32
    %108 = vector.broadcast %cst_29 : f32 to vector<2x96xf32>
    %109 = arith.addf %107, %108 : vector<2x96xf32>
    %110 = vector.extract_strided_slice %101 {offsets = [0, 96], sizes = [2, 32], strides = [1, 1]} : vector<2x128xf32> to vector<2x32xf32>
    %111 = math.tanh %110 : vector<2x32xf32>
    %112 = vector.extract_strided_slice %109 {offsets = [0, 0], sizes = [2, 32], strides = [1, 1]} : vector<2x96xf32> to vector<2x32xf32>
    %113 = vector.extract_strided_slice %109 {offsets = [0, 32], sizes = [2, 32], strides = [1, 1]} : vector<2x96xf32> to vector<2x32xf32>
    %114 = vector.extract_strided_slice %109 {offsets = [0, 64], sizes = [2, 32], strides = [1, 1]} : vector<2x96xf32> to vector<2x32xf32>
    %115 = arith.mulf %113, %94 : vector<2x32xf32>
    %116 = arith.mulf %112, %111 : vector<2x32xf32>
    %117 = arith.addf %115, %116 : vector<2x32xf32>
    %118 = math.tanh %117 : vector<2x32xf32>
    %119 = arith.mulf %114, %118 : vector<2x32xf32>
    %cst_30 = arith.constant dense<0.000000e+00> : vector<2x256xf32>
    %120 = tpu.matmul %119, %2, %cst_30 {dimension_numbers = #tpu.dot_dimension_numbers<[1], [0], [0], [1], [0, 0, 1, 1], [], []>} : vector<2x32xf32>, vector<32x256xf32>, vector<2x256xf32> -> vector<2x256xf32>
    %121 = vector.broadcast %3 : vector<1x256xf32> to vector<2x256xf32>
    %122 = arith.addf %120, %121 : vector<2x256xf32>
    %123 = vector.extract_strided_slice %122 {offsets = [0, 128], sizes = [2, 4], strides = [1, 1]} : vector<2x256xf32> to vector<2x4xf32>
    %124 = vector.extract_strided_slice %122 {offsets = [0, 0], sizes = [2, 128], strides = [1, 1]} : vector<2x256xf32> to vector<2x128xf32>
    %125 = vector.extract_strided_slice %124 {offsets = [0, 0], sizes = [2, 96], strides = [1, 1]} : vector<2x128xf32> to vector<2x96xf32>
    %cst_31 = arith.constant 5.000000e-01 : f32
    %126 = vector.broadcast %cst_31 : f32 to vector<2x96xf32>
    %127 = arith.mulf %126, %125 : vector<2x96xf32>
    %128 = math.tanh %127 : vector<2x96xf32>
    %cst_32 = arith.constant 5.000000e-01 : f32
    %129 = vector.broadcast %cst_32 : f32 to vector<2x96xf32>
    %130 = arith.mulf %129, %128 : vector<2x96xf32>
    %cst_33 = arith.constant 5.000000e-01 : f32
    %131 = vector.broadcast %cst_33 : f32 to vector<2x96xf32>
    %132 = arith.addf %130, %131 : vector<2x96xf32>
    %133 = vector.extract_strided_slice %124 {offsets = [0, 96], sizes = [2, 32], strides = [1, 1]} : vector<2x128xf32> to vector<2x32xf32>
    %134 = math.tanh %133 : vector<2x32xf32>
    %135 = vector.extract_strided_slice %132 {offsets = [0, 0], sizes = [2, 32], strides = [1, 1]} : vector<2x96xf32> to vector<2x32xf32>
    %136 = vector.extract_strided_slice %132 {offsets = [0, 32], sizes = [2, 32], strides = [1, 1]} : vector<2x96xf32> to vector<2x32xf32>
    %137 = vector.extract_strided_slice %132 {offsets = [0, 64], sizes = [2, 32], strides = [1, 1]} : vector<2x96xf32> to vector<2x32xf32>
    %138 = arith.mulf %136, %117 : vector<2x32xf32>
    %139 = arith.mulf %135, %134 : vector<2x32xf32>
    %140 = arith.addf %138, %139 : vector<2x32xf32>
    %141 = math.tanh %140 : vector<2x32xf32>
    %142 = arith.mulf %137, %141 : vector<2x32xf32>
    %cst_34 = arith.constant dense<0.000000e+00> : vector<2x256xf32>
    %143 = tpu.matmul %142, %2, %cst_34 {dimension_numbers = #tpu.dot_dimension_numbers<[1], [0], [0], [1], [0, 0, 1, 1], [], []>} : vector<2x32xf32>, vector<32x256xf32>, vector<2x256xf32> -> vector<2x256xf32>
    %144 = vector.broadcast %3 : vector<1x256xf32> to vector<2x256xf32>
    %145 = arith.addf %143, %144 : vector<2x256xf32>
    %146 = vector.extract_strided_slice %145 {offsets = [0, 128], sizes = [2, 4], strides = [1, 1]} : vector<2x256xf32> to vector<2x4xf32>
    %147 = vector.extract_strided_slice %145 {offsets = [0, 0], sizes = [2, 128], strides = [1, 1]} : vector<2x256xf32> to vector<2x128xf32>
    %148 = vector.extract_strided_slice %147 {offsets = [0, 0], sizes = [2, 96], strides = [1, 1]} : vector<2x128xf32> to vector<2x96xf32>
    %cst_35 = arith.constant 5.000000e-01 : f32
    %149 = vector.broadcast %cst_35 : f32 to vector<2x96xf32>
    %150 = arith.mulf %149, %148 : vector<2x96xf32>
    %151 = math.tanh %150 : vector<2x96xf32>
    %cst_36 = arith.constant 5.000000e-01 : f32
    %152 = vector.broadcast %cst_36 : f32 to vector<2x96xf32>
    %153 = arith.mulf %152, %151 : vector<2x96xf32>
    %cst_37 = arith.constant 5.000000e-01 : f32
    %154 = vector.broadcast %cst_37 : f32 to vector<2x96xf32>
    %155 = arith.addf %153, %154 : vector<2x96xf32>
    %156 = vector.extract_strided_slice %147 {offsets = [0, 96], sizes = [2, 32], strides = [1, 1]} : vector<2x128xf32> to vector<2x32xf32>
    %157 = math.tanh %156 : vector<2x32xf32>
    %158 = vector.extract_strided_slice %155 {offsets = [0, 0], sizes = [2, 32], strides = [1, 1]} : vector<2x96xf32> to vector<2x32xf32>
    %159 = vector.extract_strided_slice %155 {offsets = [0, 32], sizes = [2, 32], strides = [1, 1]} : vector<2x96xf32> to vector<2x32xf32>
    %160 = vector.extract_strided_slice %155 {offsets = [0, 64], sizes = [2, 32], strides = [1, 1]} : vector<2x96xf32> to vector<2x32xf32>
    %161 = arith.mulf %159, %140 : vector<2x32xf32>
    %162 = arith.mulf %158, %157 : vector<2x32xf32>
    %163 = arith.addf %161, %162 : vector<2x32xf32>
    %164 = math.tanh %163 : vector<2x32xf32>
    %165 = arith.mulf %160, %164 : vector<2x32xf32>
    %cst_38 = arith.constant dense<0.000000e+00> : vector<2x256xf32>
    %166 = tpu.matmul %165, %2, %cst_38 {dimension_numbers = #tpu.dot_dimension_numbers<[1], [0], [0], [1], [0, 0, 1, 1], [], []>} : vector<2x32xf32>, vector<32x256xf32>, vector<2x256xf32> -> vector<2x256xf32>
    %167 = vector.broadcast %3 : vector<1x256xf32> to vector<2x256xf32>
    %168 = arith.addf %166, %167 : vector<2x256xf32>
    %169 = vector.extract_strided_slice %168 {offsets = [0, 128], sizes = [2, 4], strides = [1, 1]} : vector<2x256xf32> to vector<2x4xf32>
    %170 = vector.extract_strided_slice %168 {offsets = [0, 0], sizes = [2, 128], strides = [1, 1]} : vector<2x256xf32> to vector<2x128xf32>
    %171 = vector.extract_strided_slice %170 {offsets = [0, 0], sizes = [2, 96], strides = [1, 1]} : vector<2x128xf32> to vector<2x96xf32>
    %cst_39 = arith.constant 5.000000e-01 : f32
    %172 = vector.broadcast %cst_39 : f32 to vector<2x96xf32>
    %173 = arith.mulf %172, %171 : vector<2x96xf32>
    %174 = math.tanh %173 : vector<2x96xf32>
    %cst_40 = arith.constant 5.000000e-01 : f32
    %175 = vector.broadcast %cst_40 : f32 to vector<2x96xf32>
    %176 = arith.mulf %175, %174 : vector<2x96xf32>
    %cst_41 = arith.constant 5.000000e-01 : f32
    %177 = vector.broadcast %cst_41 : f32 to vector<2x96xf32>
    %178 = arith.addf %176, %177 : vector<2x96xf32>
    %179 = vector.extract_strided_slice %170 {offsets = [0, 96], sizes = [2, 32], strides = [1, 1]} : vector<2x128xf32> to vector<2x32xf32>
    %180 = math.tanh %179 : vector<2x32xf32>
    %181 = vector.extract_strided_slice %178 {offsets = [0, 0], sizes = [2, 32], strides = [1, 1]} : vector<2x96xf32> to vector<2x32xf32>
    %182 = vector.extract_strided_slice %178 {offsets = [0, 32], sizes = [2, 32], strides = [1, 1]} : vector<2x96xf32> to vector<2x32xf32>
    %183 = vector.extract_strided_slice %178 {offsets = [0, 64], sizes = [2, 32], strides = [1, 1]} : vector<2x96xf32> to vector<2x32xf32>
    %184 = arith.mulf %182, %163 : vector<2x32xf32>
    %185 = arith.mulf %181, %180 : vector<2x32xf32>
    %186 = arith.addf %184, %185 : vector<2x32xf32>
    %187 = math.tanh %186 : vector<2x32xf32>
    %188 = arith.mulf %183, %187 : vector<2x32xf32>
    %cst_42 = arith.constant dense<0.000000e+00> : vector<2x4xf32>
    %189 = tpu.matmul %188, %4, %cst_42 {dimension_numbers = #tpu.dot_dimension_numbers<[1], [0], [0], [1], [0, 0, 1, 1], [], []>} : vector<2x32xf32>, vector<32x4xf32>, vector<2x4xf32> -> vector<2x4xf32>
    %190 = vector.broadcast %5 : vector<1x4xf32> to vector<2x4xf32>
    %191 = arith.addf %189, %190 : vector<2x4xf32>
    %192 = tpu.concatenate %31, %54, %77, %100, %123, %146, %169, %191 in 1 : vector<2x4xf32>, vector<2x4xf32>, vector<2x4xf32>, vector<2x4xf32>, vector<2x4xf32>, vector<2x4xf32>, vector<2x4xf32>, vector<2x4xf32> -> vector<2x32xf32>
    %c0_43 = arith.constant 0 : index
    %c0_44 = arith.constant 0 : index
    %193 = vector.load %arg7[%c0_43, %c0_44] : memref<2x32xf32, #tpu.memory_space<vmem>>, vector<2x32xf32>
    tpu.vector_store %arg7[%c0_43, %c0_44], %192 {strides = array<i32>} : memref<2x32xf32, #tpu.memory_space<vmem>>, vector<2x32xf32>,
    return
  }
  func.func @transform_0(%arg0: i32) -> (i32, i32) {
    %c0_i32 = arith.constant 0 : i32
    %c0_i32_0 = arith.constant 0 : i32
    return %arg0, %c0_i32 : i32, i32
  }
  func.func @transform_1(%arg0: i32) -> (i32, i32) {
    %c0_i32 = arith.constant 0 : i32
    %c0_i32_0 = arith.constant 0 : i32
    return %arg0, %c0_i32 : i32, i32
  }
  func.func @transform_2(%arg0: i32) -> (i32, i32) {
    %c0_i32 = arith.constant 0 : i32
    %c0_i32_0 = arith.constant 0 : i32
    %c0_i32_1 = arith.constant 0 : i32
    return %c0_i32, %c0_i32_0 : i32, i32
  }
  func.func @transform_3(%arg0: i32) -> (i32, i32) {
    %c0_i32 = arith.constant 0 : i32
    %c0_i32_0 = arith.constant 0 : i32
    %c0_i32_1 = arith.constant 0 : i32
    return %c0_i32, %c0_i32_0 : i32, i32
  }
  func.func @transform_4(%arg0: i32) -> (i32, i32) {
    %c0_i32 = arith.constant 0 : i32
    %c0_i32_0 = arith.constant 0 : i32
    %c0_i32_1 = arith.constant 0 : i32
    return %c0_i32, %c0_i32_0 : i32, i32
  }
  func.func @transform_5(%arg0: i32) -> (i32, i32) {
    %c0_i32 = arith.constant 0 : i32
    %c0_i32_0 = arith.constant 0 : i32
    %c0_i32_1 = arith.constant 0 : i32
    return %c0_i32, %c0_i32_0 : i32, i32
  }
  func.func @transform_6(%arg0: i32) -> (i32, i32) {
    %c0_i32 = arith.constant 0 : i32
    %c0_i32_0 = arith.constant 0 : i32
    return %arg0, %c0_i32 : i32, i32
  }
}

</mosaic_0001>

<bundles_post_ra>
// kernel: tpu_custom_call.1
= control target key start
LH: loop header
LB: loop body
LE: loop exit
PB: predicated region body
PF: predicated region fallthrough
CT: control target
= control target key end

     0   :  { %11 = vsyncpa [#allocation3], 0  ;;  %s1016_s0 = inlined_call_operand.vmem [shape: f32[2,32], index: 0, kind: input, shape index: {}]   ;;  %s1017_s1 = inlined_call_operand.vmem [shape: f32[2,32], index: 1, kind: input, shape index: {}]   ;;  %s1018_s2 = inlined_call_operand.hbm [shape: f32[32,256], index: 2, kind: input, shape index: {}]   ;;  %s1019_s3 = inlined_call_operand.vmem [shape: f32[1,256], index: 3, kind: input, shape index: {}]   ;;  %s1020_s4 = inlined_call_operand.vmem [shape: f32[32,4], index: 4, kind: input, shape index: {}]   ;;  %s1021_s5 = inlined_call_operand.vmem [shape: f32[1,4], index: 5, kind: input, shape index: {}]   ;;  %s1022_s6 = inlined_call_operand.hbm [shape: f32[2,32], index: 6, kind: output, shape index: {}]  }
   0x1   :  { %12 = vsyncpa [#allocation4], 0  ;;  %s21_s23 = sshll.u32 %s1018_s2, 4  ;;  %s798_s24 = smov [#allocation2]   ;;  %s22_s23 = int_to_ptr.hbm [resolvable:$true] %s21_s23 }
   0x2   :  { %s23_s25 = sshll.u32 %s798_s24, 4  ;;  %s799_s26 = smov 256   ;;  %s24_s25 = int_to_ptr.vmem [resolvable:$true] %s23_s25 }
   0x3   :  { %s800_s27 = smov 16  }
   0x4   :  { %29 = dma.hbm_to_vmem [thread:$0]  %s22_s23, 1024, %s24_s25, [#allocation3], %s799_s26, %s799_s26, %s800_s27  }
   0x5   :  { %794 = dma.done.wait [#allocation3], 1024  }
   0x6   :  { %795 = vsyncadd [#allocation3], 4294966272  ;;  %v849_v0 = vld [vmem:[#allocation2 + $0x30] sm:$0xff]  ;;  %v851_v1 = vld [vmem:[#allocation2 + $0x20] sm:$0xff]  ;;  %vm61_vm0 = vcmask 261120   ;;  %s801_s30 = smov 32  }
   0x7   :  { %77 = vmatpush.msra.mxu0 %v849_v0  ;;  %128 = vmatpush.msra.mxu1 %v849_v0  ;;  %v855_v2 = vld [vmem:[#allocation2 + $0x10] sm:$0xff]  ;;  %v860_v3 = vld [vmem:[#allocation2] sm:$0xff]  ;;  %v897_v22 = vld [vmem:[#allocation2 + $0x38] sm:$0xff]  ;;  %s804_s9 = smov 8   ;;  %s805_s10 = smov 20   ;;  %vm636_vm1 = vcmask 31744  }
   0x8   :  { %195 = vmatpush.msra.mxu3 %v849_v0  ;;  %v40_v4 = vld [vmem:[%s1016_s0] sm:$0x3]  ;;  %v899_v23 = vld [vmem:[#allocation2 + $0x28] sm:$0xff]  ;;  %148 = vmatpush.msra.mxu2 %v897_v22  ;;  %v903_v24 = vld [vmem:[#allocation2 + $0x18] sm:$0xff]  ;;  %s806_s19 = smov 12   ;;  %s807_s20 = smov 24  }
   0x9   :  { %78 = vmatpush.msra.mxu0 %v851_v1  ;;  %129 = vmatpush.msra.mxu1 %v851_v1  ;;  %v884_v5 = vld [vmem:[%s1019_s3] sm:$0x3]  ;;  %v907_v25 = vld [vmem:[#allocation2 + $0x8] sm:$0xff]  ;;  %s803_s3 = smov 4   ;;  %vm638_vm2 = vcmask 64512   ;;  %vm640_vm3 = vcmask 97280  }
   0xa   :  { %196 = vmatpush.msra.mxu3 %v851_v1  ;;  %v887_v6 = vperm.slane %v884_v5, 0  ;;  %v41_v10 = vld [vmem:[%s1017_s1] sm:$0x3]  ;;  %149 = vmatpush.msra.mxu2 %v899_v23  ;;  %s802_s1 = smov 64   ;;  %vm642_vm4 = vcmask 130048   ;;  %vm644_vm5 = vcmask 162816  }
   0xb   :  { %79 = vmatpush.msra.mxu0 %v855_v2  ;;  %130 = vmatpush.msra.mxu1 %v855_v2  ;;  %vm646_vm6 = vcmask 195584   ;;  %s659_s26 = sshll.u32 %s1022_s6, 4  ;;  %vm648_vm7 = vcmask 228352   ;;  %vm650_vm8 = vcmask 254976   ;;  %s660_s26 = int_to_ptr.hbm [resolvable:$true] %s659_s26 }
   0xc   :  { %197 = vmatpush.msra.mxu3 %v855_v2  ;;  %150 = vmatpush.msra.mxu2 %v903_v24 }
   0xd   :  { %80 = vmatpush.msra.mxu0 %v860_v3  ;;  %131 = vmatpush.msra.mxu1 %v860_v3 }
   0xe   :  { %669 = vmatmul.msk.f32.vlgmr.msra.gmra.mxu0 %vm61_vm0, %v40_v4  ;;  %198 = vmatpush.msra.mxu3 %v860_v3 }
   0xf   :  { %262 = vmatpush.msrb.mxu1 %v849_v0  ;;  %215 = vmatpush.msrb.mxu0 %v897_v22 }
  0x10   :  { %329 = vmatpush.msrb.mxu3 %v849_v0  ;;  %151 = vmatpush.msra.mxu2 %v907_v25 }
  0x11   :  { %263 = vmatpush.msrb.mxu1 %v851_v1  ;;  %216 = vmatpush.msrb.mxu0 %v899_v23 }
  0x12   :  { %330 = vmatpush.msrb.mxu3 %v851_v1  ;;  %282 = vmatpush.msrb.mxu2 %v897_v22 }
  0x13   :  { %264 = vmatpush.msrb.mxu1 %v855_v2  ;;  %217 = vmatpush.msrb.mxu0 %v903_v24 }
  0x14   :  { %331 = vmatpush.msrb.mxu3 %v855_v2  ;;  %283 = vmatpush.msrb.mxu2 %v899_v23 }
  0x15   :  { %265 = vmatpush.msrb.mxu1 %v860_v3  ;;  %218 = vmatpush.msrb.mxu0 %v907_v25 }
  0x16   :  { %332 = vmatpush.msrb.mxu3 %v860_v3  ;;  %284 = vmatpush.msrb.mxu2 %v903_v24 }
  0x17   :  { %349 = vmatpush.msra.mxu0 %v897_v22 }
  0x18   :  { %285 = vmatpush.msrb.mxu2 %v907_v25 }
  0x19   :  { %350 = vmatpush.msra.mxu0 %v899_v23 }
  0x1b   :  { %351 = vmatpush.msra.mxu0 %v903_v24 }
  0x1d   :  { %352 = vmatpush.msra.mxu0 %v907_v25 }
  0x8b   :  { %v82_v7 = vpop.f32.mrf.mxu0 }
  0x8c   :  { %v83_v8 = vadd.f32 %v82_v7, %v887_v6 }
  0x8e   :  { %698 = vtanh.f32 %v83_v8  ;;  %v85_v11 = vmul.f32 0.5, %v83_v8 }
  0x90   :  { %700 = vtanh.f32 %v85_v11 }
  0x94   :  { %v699_v9 = vpop.eup %698 }
  0x95   :  { %96 = vrot.lane.b32.xlu0 %v699_v9, %s801_s30 }
  0x96   :  { %v701_v12 = vpop.eup %700 }
  0x97   :  { %v87_v13 = vmul.f32 0.5, %v701_v12 }
  0x99   :  { %v88_v14 = vadd.f32 0.5, %v87_v13 }
  0x9d   :  { %91 = vrot.lane.b32.xlu0 %v41_v10, %s801_s30 }
 0x107   :  { %v97_v15 = vpop.permute.xlu0 %96 }
 0x108   :  { %v99_v16 = vmul.f32 %v97_v15, %v88_v14 }
 0x10a   :  { %101 = vrot.lane.b32.xlu1 %v99_v16, %s801_s30 }
 0x10f   :  { %v92_v17 = vpop.permute.xlu0 %91 }
 0x110   :  { %v94_v18 = vmul.f32 %v92_v17, %v88_v14 }
 0x17c   :  { %v102_v19 = vpop.permute.xlu1 %101 }
 0x17d   :  { %v104_v20 = vadd.f32 %v102_v19, %v94_v18 }
 0x17f   :  { %702 = vtanh.f32 %v104_v20 }
 0x185   :  { %v703_v21 = vpop.eup %702 }
 0x186   :  { %107 = vrot.lane.b32.xlu1 %v703_v21, %s801_s30 }
 0x1f8   :  { %v108_v26 = vpop.permute.xlu1 %107 }
 0x1f9   :  { %v110_v27 = vmul.f32 %v108_v26, %v88_v14 }
 0x1fb   :  { %112 = vrot.lane.b32.xlu2 %v110_v27, %s802_s1 }
 0x255   :  { %v113_v28 = vpop.permute.xlu2 %112 }
 0x256   :  { %670 = vmatmul.msk.f32.vlgmr.msra.gmra.mxu1 %vm61_vm0, %v113_v28  ;;  %671 = vmatmul.msk.f32.vlgmr.msra.gmra.mxu2 %vm61_vm0, %v113_v28 }
 0x257   :  { %396 = vmatpush.msra.mxu1 %v849_v0  ;;  %416 = vmatpush.msra.mxu2 %v897_v22 }
 0x259   :  { %397 = vmatpush.msra.mxu1 %v851_v1  ;;  %417 = vmatpush.msra.mxu2 %v899_v23 }
 0x25b   :  { %398 = vmatpush.msra.mxu1 %v855_v2  ;;  %418 = vmatpush.msra.mxu2 %v903_v24 }
 0x25d   :  { %399 = vmatpush.msra.mxu1 %v860_v3  ;;  %419 = vmatpush.msra.mxu2 %v907_v25 }
 0x2d3   :  { %v133_v29 = vpop.f32.mrf.mxu1 }
 0x2d4   :  { %v134_v30 = vadd.f32 %v133_v29, %v887_v6 }
 0x2d6   :  { %704 = vtanh.f32 %v134_v30  ;;  %v156_v32 = vmul.f32 0.5, %v134_v30 }
 0x2d8   :  { %706 = vtanh.f32 %v156_v32 }
 0x2dc   :  { %v705_v31 = vpop.eup %704 }
 0x2dd   :  { %163 = vrot.lane.b32.xlu2 %v705_v31, %s801_s30 }
 0x2de   :  { %v707_v33 = vpop.eup %706 }
 0x2df   :  { %v158_v34 = vmul.f32 0.5, %v707_v33 }
 0x2e1   :  { %v159_v35 = vadd.f32 0.5, %v158_v34 }
 0x2e3   :  { %v161_v38 = vmul.f32 %v159_v35, %v104_v20 }
 0x337   :  { %v164_v36 = vpop.permute.xlu2 %163 }
 0x338   :  { %v166_v37 = vmul.f32 %v164_v36, %v159_v35 }
 0x33a   :  { %168 = vrot.lane.b32.xlu0 %v166_v37, %s801_s30 }
 0x3ac   :  { %v169_v39 = vpop.permute.xlu0 %168 }
 0x3ad   :  { %v171_v40 = vadd.f32 %v169_v39, %v161_v38 }
 0x3af   :  { %708 = vtanh.f32 %v171_v40 }
 0x3b5   :  { %v709_v41 = vpop.eup %708 }
 0x3b6   :  { %174 = vrot.lane.b32.xlu1 %v709_v41, %s801_s30 }
 0x428   :  { %v175_v42 = vpop.permute.xlu1 %174 }
 0x429   :  { %v177_v43 = vmul.f32 %v175_v42, %v159_v35 }
 0x42b   :  { %179 = vrot.lane.b32.xlu2 %v177_v43, %s802_s1 }
 0x485   :  { %v180_v44 = vpop.permute.xlu2 %179 }
 0x486   :  { %672 = vmatmul.msk.f32.vlgmr.msra.gmra.mxu3 %vm61_vm0, %v180_v44  ;;  %673 = vmatmul.msk.f32.vlgmr.msrb.gmra.mxu0 %vm61_vm0, %v180_v44 }
 0x487   :  { %463 = vmatpush.msra.mxu3 %v849_v0  ;;  %483 = vmatpush.msrb.mxu0 %v897_v22 }
 0x489   :  { %464 = vmatpush.msra.mxu3 %v851_v1  ;;  %484 = vmatpush.msrb.mxu0 %v899_v23 }
 0x48b   :  { %465 = vmatpush.msra.mxu3 %v855_v2  ;;  %485 = vmatpush.msrb.mxu0 %v903_v24 }
 0x48d   :  { %466 = vmatpush.msra.mxu3 %v860_v3  ;;  %486 = vmatpush.msrb.mxu0 %v907_v25 }
 0x509   :  { %v200_v45 = vpop.f32.mrf.mxu3 }
 0x50a   :  { %v201_v46 = vadd.f32 %v200_v45, %v887_v6 }
 0x50c   :  { %710 = vtanh.f32 %v201_v46  ;;  %v223_v48 = vmul.f32 0.5, %v201_v46 }
 0x50e   :  { %712 = vtanh.f32 %v223_v48 }
 0x512   :  { %v711_v47 = vpop.eup %710 }
 0x513   :  { %230 = vrot.lane.b32.xlu0 %v711_v47, %s801_s30 }
 0x514   :  { %v713_v49 = vpop.eup %712 }
 0x515   :  { %v225_v50 = vmul.f32 0.5, %v713_v49 }
 0x517   :  { %v226_v51 = vadd.f32 0.5, %v225_v50 }
 0x519   :  { %v228_v54 = vmul.f32 %v226_v51, %v171_v40 }
 0x585   :  { %v231_v52 = vpop.permute.xlu0 %230 }
 0x586   :  { %v233_v53 = vmul.f32 %v231_v52, %v226_v51 }
 0x588   :  { %235 = vrot.lane.b32.xlu1 %v233_v53, %s801_s30 }
 0x5fa   :  { %v236_v55 = vpop.permute.xlu1 %235 }
 0x5fb   :  { %v238_v56 = vadd.f32 %v236_v55, %v228_v54 }
 0x5fd   :  { %714 = vtanh.f32 %v238_v56 }
 0x603   :  { %v715_v57 = vpop.eup %714 }
 0x604   :  { %241 = vrot.lane.b32.xlu2 %v715_v57, %s801_s30 }
 0x65e   :  { %v242_v58 = vpop.permute.xlu2 %241 }
 0x65f   :  { %v244_v59 = vmul.f32 %v242_v58, %v226_v51 }
 0x661   :  { %246 = vrot.lane.b32.xlu0 %v244_v59, %s802_s1 }
 0x6d3   :  { %v247_v60 = vpop.permute.xlu0 %246 }
 0x6d4   :  { %674 = vmatmul.msk.f32.vlgmr.msrb.gmra.mxu1 %vm61_vm0, %v247_v60  ;;  %675 = vmatmul.msk.f32.vlgmr.msrb.gmra.mxu2 %vm61_vm0, %v247_v60 }
 0x6d5   :  { %530 = vmatpush.msrb.mxu1 %v849_v0  ;;  %550 = vmatpush.msrb.mxu2 %v897_v22 }
 0x6d7   :  { %531 = vmatpush.msrb.mxu1 %v851_v1  ;;  %551 = vmatpush.msrb.mxu2 %v899_v23 }
 0x6d9   :  { %532 = vmatpush.msrb.mxu1 %v855_v2  ;;  %552 = vmatpush.msrb.mxu2 %v903_v24 }
 0x6db   :  { %533 = vmatpush.msrb.mxu1 %v860_v3  ;;  %553 = vmatpush.msrb.mxu2 %v907_v25 }
 0x751   :  { %v267_v61 = vpop.f32.mrf.mxu1 }
 0x752   :  { %v268_v62 = vadd.f32 %v267_v61, %v887_v6 }
 0x754   :  { %716 = vtanh.f32 %v268_v62  ;;  %v290_v0 = vmul.f32 0.5, %v268_v62 }
 0x756   :  { %718 = vtanh.f32 %v290_v0 }
 0x75a   :  { %v717_v63 = vpop.eup %716 }
 0x75b   :  { %297 = vrot.lane.b32.xlu1 %v717_v63, %s801_s30 }
 0x75c   :  { %v719_v1 = vpop.eup %718 }
 0x75d   :  { %v292_v4 = vmul.f32 0.5, %v719_v1 }
 0x75f   :  { %v293_v7 = vadd.f32 0.5, %v292_v4 }
 0x761   :  { %v295_v9 = vmul.f32 %v293_v7, %v238_v56 }
 0x7cd   :  { %v298_v8 = vpop.permute.xlu1 %297 }
 0x7ce   :  { %v300_v2 = vmul.f32 %v298_v8, %v293_v7 }
 0x7d0   :  { %302 = vrot.lane.b32.xlu2 %v300_v2, %s801_s30  ;;  %v153_v2 = vpop.f32.mrf.mxu2 }
 0x82a   :  { %v303_v3 = vpop.permute.xlu2 %302 }
 0x82b   :  { %v305_v10 = vadd.f32 %v303_v3, %v295_v9 }
 0x82d   :  { %720 = vtanh.f32 %v305_v10 }
 0x833   :  { %v721_v11 = vpop.eup %720 }
 0x834   :  { %308 = vrot.lane.b32.xlu0 %v721_v11, %s801_s30  ;;  %v220_v11 = vpop.f32.mrf.mxu0 }
 0x8a6   :  { %v309_v12 = vpop.permute.xlu0 %308 }
 0x8a7   :  { %v311_v13 = vmul.f32 %v309_v12, %v293_v7  ;;  %v287_v12 = vpop.f32.mrf.mxu2 }
 0x8a9   :  { %313 = vrot.lane.b32.xlu1 %v311_v13, %s802_s1  ;;  %v58_v13 = vperm.slane %v884_v5, 1 }
 0x91b   :  { %v314_v14 = vpop.permute.xlu1 %313 }
 0x91c   :  { %676 = vmatmul.msk.f32.vlgmr.msrb.gmra.mxu3 %vm61_vm0, %v314_v14  ;;  %677 = vmatmul.msk.f32.vlgmr.msra.gmra.mxu0 %vm61_vm0, %v314_v14  ;;  %v221_v14 = vadd.f32 %v220_v11, %v58_v13 }
 0x99f   :  { %v334_v15 = vpop.f32.mrf.mxu3 }
 0x9a0   :  { %v335_v16 = vadd.f32 %v334_v15, %v887_v6 }
 0x9a2   :  { %722 = vtanh.f32 %v335_v16  ;;  %v357_v18 = vmul.f32 0.5, %v335_v16 }
 0x9a4   :  { %724 = vtanh.f32 %v357_v18 }
 0x9a8   :  { %v723_v17 = vpop.eup %722 }
 0x9a9   :  { %364 = vrot.lane.b32.xlu2 %v723_v17, %s801_s30 }
 0x9aa   :  { %v725_v19 = vpop.eup %724 }
 0x9ab   :  { %v359_v20 = vmul.f32 0.5, %v725_v19 }
 0x9ad   :  { %v360_v21 = vadd.f32 0.5, %v359_v20  ;;  %v354_v20 = vpop.f32.mrf.mxu0 }
 0x9af   :  { %v362_v24 = vmul.f32 %v360_v21, %v305_v10 }
 0xa03   :  { %v365_v22 = vpop.permute.xlu2 %364 }
 0xa04   :  { %v367_v23 = vmul.f32 %v365_v22, %v360_v21 }
 0xa06   :  { %369 = vrot.lane.b32.xlu0 %v367_v23, %s801_s30  ;;  %v54_v23 = vld [vmem:[%s1020_s4 + $0x18] sm:$0xff] }
 0xa07   :  { %600 = vmatpush.msrb.mxu3 %v54_v23 }
 0xa78   :  { %v370_v25 = vpop.permute.xlu0 %369 }
 0xa79   :  { %v372_v26 = vadd.f32 %v370_v25, %v362_v24  ;;  %v53_v24 = vld [vmem:[%s1020_s4 + $0x10] sm:$0xff]  ;;  %v52_v25 = vld [vmem:[%s1020_s4 + $0x8] sm:$0xff] }
 0xa7a   :  { %601 = vmatpush.msrb.mxu3 %v53_v24 }
 0xa7b   :  { %726 = vtanh.f32 %v372_v26 }
 0xa7c   :  { %602 = vmatpush.msrb.mxu3 %v52_v25 }
 0xa81   :  { %v727_v27 = vpop.eup %726 }
 0xa82   :  { %375 = vrot.lane.b32.xlu1 %v727_v27, %s801_s30 }
 0xaf4   :  { %v376_v28 = vpop.permute.xlu1 %375 }
 0xaf5   :  { %v378_v29 = vmul.f32 %v376_v28, %v360_v21  ;;  %v288_v21 = vadd.f32 %v287_v12, %v58_v13 }
 0xaf7   :  { %380 = vrot.lane.b32.xlu2 %v378_v29, %s802_s1  ;;  %v355_v29 = vadd.f32 %v354_v20, %v58_v13 }
 0xb51   :  { %v381_v30 = vpop.permute.xlu2 %380 }
 0xb52   :  { %678 = vmatmul.msk.f32.vlgmr.msra.gmra.mxu1 %vm61_vm0, %v381_v30  ;;  %679 = vmatmul.msk.f32.vlgmr.msra.gmra.mxu2 %vm61_vm0, %v381_v30 }
 0xbcf   :  { %v401_v31 = vpop.f32.mrf.mxu1 }
 0xbd0   :  { %v402_v32 = vadd.f32 %v401_v31, %v887_v6 }
 0xbd2   :  { %728 = vtanh.f32 %v402_v32  ;;  %v424_v34 = vmul.f32 0.5, %v402_v32 }
 0xbd4   :  { %730 = vtanh.f32 %v424_v34 }
 0xbd8   :  { %v729_v33 = vpop.eup %728 }
 0xbd9   :  { %431 = vrot.lane.b32.xlu0 %v729_v33, %s801_s30  ;;  %v697_v33 = vld [vmem:[%s1021_s5] ss:$0 sm:$0xff]  ;;  %s809_s5 = smov [#allocation5]  }
 0xbda   :  { %v731_v35 = vpop.eup %730  ;;  %s657_s23 = sshll.u32 %s809_s5, 4  ;;  %s658_s23 = int_to_ptr.vmem [resolvable:$true] %s657_s23 }
 0xbdb   :  { %v426_v36 = vmul.f32 0.5, %v731_v35 }
 0xbdd   :  { %v427_v37 = vadd.f32 0.5, %v426_v36 }
 0xbdf   :  { %v429_v40 = vmul.f32 %v427_v37, %v372_v26  ;;  %v51_v26 = vld [vmem:[%s1020_s4] sm:$0xff]  ;;  %s808_s4 = smov 28  }
 0xbe0   :  { %603 = vmatpush.msrb.mxu3 %v51_v26 }
 0xc4b   :  { %v432_v38 = vpop.permute.xlu0 %431 }
 0xc4c   :  { %v434_v39 = vmul.f32 %v432_v38, %v427_v37 }
 0xc4e   :  { %436 = vrot.lane.b32.xlu1 %v434_v39, %s801_s30  ;;  %v154_v39 = vadd.f32 %v153_v2, %v58_v13 }
 0xcc0   :  { %v437_v41 = vpop.permute.xlu1 %436 }
 0xcc1   :  { %v439_v42 = vadd.f32 %v437_v41, %v429_v40 }
 0xcc3   :  { %732 = vtanh.f32 %v439_v42 }
 0xcc9   :  { %v733_v43 = vpop.eup %732 }
 0xcca   :  { %442 = vrot.lane.b32.xlu2 %v733_v43, %s801_s30 }
 0xd24   :  { %v443_v44 = vpop.permute.xlu2 %442 }
 0xd25   :  { %v445_v45 = vmul.f32 %v443_v44, %v427_v37 }
 0xd27   :  { %447 = vrot.lane.b32.xlu0 %v445_v45, %s802_s1 }
 0xd99   :  { %v448_v46 = vpop.permute.xlu0 %447 }
 0xd9a   :  { %680 = vmatmul.msk.f32.vlgmr.msra.gmra.mxu3 %vm61_vm0, %v448_v46  ;;  %681 = vmatmul.msk.f32.vlgmr.msrb.gmra.mxu0 %vm61_vm0, %v448_v46 }
 0xe17   :  { %v488_v22 = vpop.f32.mrf.mxu0 }
 0xe18   :  { %v489_v5 = vadd.f32 %v488_v22, %v58_v13 }
 0xe1d   :  { %v468_v47 = vpop.f32.mrf.mxu3 }
 0xe1e   :  { %v469_v48 = vadd.f32 %v468_v47, %v887_v6 }
 0xe20   :  { %734 = vtanh.f32 %v469_v48  ;;  %v491_v50 = vmul.f32 0.5, %v469_v48 }
 0xe22   :  { %736 = vtanh.f32 %v491_v50 }
 0xe26   :  { %v735_v49 = vpop.eup %734 }
 0xe27   :  { %498 = vrot.lane.b32.xlu1 %v735_v49, %s801_s30 }
 0xe28   :  { %v737_v51 = vpop.eup %736 }
 0xe29   :  { %v493_v52 = vmul.f32 0.5, %v737_v51 }
 0xe2b   :  { %v494_v53 = vadd.f32 0.5, %v493_v52 }
 0xe2d   :  { %v496_v56 = vmul.f32 %v494_v53, %v439_v42 }
 0xe99   :  { %v499_v54 = vpop.permute.xlu1 %498 }
 0xe9a   :  { %v501_v55 = vmul.f32 %v499_v54, %v494_v53 }
 0xe9c   :  { %503 = vrot.lane.b32.xlu2 %v501_v55, %s801_s30 }
 0xef6   :  { %v504_v57 = vpop.permute.xlu2 %503 }
 0xef7   :  { %v506_v58 = vadd.f32 %v504_v57, %v496_v56 }
 0xef9   :  { %738 = vtanh.f32 %v506_v58 }
 0xeff   :  { %v739_v59 = vpop.eup %738 }
 0xf00   :  { %509 = vrot.lane.b32.xlu0 %v739_v59, %s801_s30 }
 0xf72   :  { %v510_v60 = vpop.permute.xlu0 %509 }
 0xf73   :  { %v512_v61 = vmul.f32 %v510_v60, %v494_v53 }
 0xf75   :  { %514 = vrot.lane.b32.xlu1 %v512_v61, %s802_s1 }
 0xfe7   :  { %v515_v62 = vpop.permute.xlu1 %514 }
 0xfe8   :  { %682 = vmatmul.msk.f32.vlgmr.msrb.gmra.mxu1 %vm61_vm0, %v515_v62  ;;  %683 = vmatmul.msk.f32.vlgmr.msrb.gmra.mxu2 %vm61_vm0, %v515_v62 }
0x1065   :  { %v535_v63 = vpop.f32.mrf.mxu1 }
0x1066   :  { %v536_v0 = vadd.f32 %v535_v63, %v887_v6  ;;  %v421_v6 = vpop.f32.mrf.mxu2 }
0x1067   :  { %v422_v15 = vadd.f32 %v421_v6, %v58_v13 }
0x1068   :  { %740 = vtanh.f32 %v536_v0  ;;  %v558_v4 = vmul.f32 0.5, %v536_v0 }
0x106a   :  { %742 = vtanh.f32 %v558_v4 }
0x106e   :  { %v741_v1 = vpop.eup %740  ;;  %v555_v30 = vpop.f32.mrf.mxu2 }
0x106f   :  { %565 = vrot.lane.b32.xlu2 %v741_v1, %s801_s30  ;;  %v556_v31 = vadd.f32 %v555_v30, %v58_v13 }
0x1070   :  { %v743_v7 = vpop.eup %742 }
0x1071   :  { %v560_v8 = vmul.f32 0.5, %v743_v7 }
0x1073   :  { %v561_v9 = vadd.f32 0.5, %v560_v8 }
0x1075   :  { %v563_v16 = vmul.f32 %v561_v9, %v506_v58 }
0x10c9   :  { %v566_v3 = vpop.permute.xlu2 %565 }
0x10ca   :  { %v568_v10 = vmul.f32 %v566_v3, %v561_v9 }
0x10cc   :  { %570 = vrot.lane.b32.xlu0 %v568_v10, %s801_s30 }
0x10d4   :  { %609 = vrot.lane.b32.xlu0 %v221_v14, %s803_s3 }
0x10dc   :  { %621 = vrot.lane.b32.xlu0 %v422_v15, %s800_s27 }
0x113e   :  { %v571_v17 = vpop.permute.xlu0 %570 }
0x113f   :  { %v573_v18 = vadd.f32 %v571_v17, %v563_v16 }
0x1141   :  { %744 = vtanh.f32 %v573_v18 }
0x1146   :  { %v610_v36 = vpop.permute.xlu0 %609 }
0x1147   :  { %v745_v19 = vpop.eup %744  ;;  %v637_v40 = vsel %vm636_vm1, %v154_v39, %v610_v36 }
0x1148   :  { %576 = vrot.lane.b32.xlu1 %v745_v19, %s801_s30 }
0x114e   :  { %v622_v41 = vpop.permute.xlu0 %621 }
0x1150   :  { %613 = vrot.lane.b32.xlu1 %v288_v21, %s804_s9 }
0x1158   :  { %625 = vrot.lane.b32.xlu1 %v489_v5, %s805_s10 }
0x11ba   :  { %v577_v27 = vpop.permute.xlu1 %576 }
0x11bb   :  { %v579_v28 = vmul.f32 %v577_v27, %v561_v9 }
0x11bd   :  { %584 = vrot.lane.b32.xlu2 %v579_v28, %s802_s1 }
0x11c2   :  { %v614_v38 = vpop.permute.xlu1 %613 }
0x11c3   :  { %v639_v42 = vsel %vm638_vm2, %v637_v40, %v614_v38 }
0x11c5   :  { %617 = vrot.lane.b32.xlu2 %v355_v29, %s806_s19 }
0x11ca   :  { %v626_v46 = vpop.permute.xlu1 %625 }
0x11cd   :  { %629 = vrot.lane.b32.xlu2 %v556_v31, %s807_s20 }
0x1217   :  { %v585_v32 = vpop.permute.xlu2 %584 }
0x1218   :  { %684 = vmatmul.msk.f32.vlgmr.msrb.gmra.mxu3 %vm61_vm0, %v585_v32 }
0x121f   :  { %v618_v37 = vpop.permute.xlu2 %617 }
0x1220   :  { %v641_v43 = vsel %vm640_vm3, %v639_v42, %v618_v37 }
0x1221   :  { %v643_v44 = vsel %vm642_vm4, %v641_v43, %v622_v41 }
0x1222   :  { %v645_v47 = vsel %vm644_vm5, %v643_v44, %v626_v46 }
0x1227   :  { %v630_v45 = vpop.permute.xlu2 %629 }
0x1228   :  { %v647_v48 = vsel %vm646_vm6, %v645_v47, %v630_v45 }
0x129b   :  { %v605_v34 = vpop.f32.mrf.mxu3 }
0x129c   :  { %v606_v35 = vadd.f32 %v697_v33, %v605_v34 }
0x129e   :  { %633 = vrot.lane.b32.xlu0 %v606_v35, %s808_s4 }
0x1310   :  { %v634_v49 = vpop.permute.xlu0 %633 }
0x1311   :  { %v649_v50 = vsel %vm648_vm7, %v647_v48, %v634_v49 }
0x1312   :  { %651 = vst.msk [vmem:[#allocation5] sm:$0x3] %vm650_vm8, %v649_v50 }
0x1313   :  { %662 = dma.vmem_to_hbm [thread:$0]  %s658_s23, 32, %s660_s26, [#allocation4]  }
0x1314   :  { %796 = dma.done.wait [#allocation4], 32  }
0x1315   :  { %797 = vsyncadd [#allocation4], 4294967264 }
0x1316   :  { %667 = vsyncpa [#allocation3], 1 }
0x1317   :  { %668 = vsyncpa [#allocation4], 1 }

</bundles_post_ra>
